<compile_context>
chip_gen: v6e
topology: v6e:2x2x1
jax: 0.10.0
libtpu: 0.0.40
codegen_flags: <defaults>
</compile_context>

<pallas_src>
import jax
import jax.numpy as jnp
from jax.experimental import pallas as pl
from jax.experimental.pallas import tpu as pltpu


def _round_up(x, m):
    return ((x + m - 1) // m) * m


def _mlp_kernel(x_ref, noise_ref, w1x_ref, w1n_ref, b1_ref,
                w2_ref, b2_ref, w3_ref, b3_ref, o_ref):
    # x_ref:     [tm, din]         tile of (padded) conditioning rows
    # noise_ref: [1, tm, dnoise]   matching noise tile for this n_sample slice
    # o_ref:     [1, tm, dout_pad] lane-dense (dout padded to a multiple of 128)
    x = x_ref[...]
    nz = noise_ref[0]
    # Fused "concat": [x | nz] @ W1 == x @ W1_x + nz @ W1_n
    h1 = (jnp.dot(x, w1x_ref[...], preferred_element_type=jnp.float32)
          + jnp.dot(nz, w1n_ref[...], preferred_element_type=jnp.float32)
          + b1_ref[...])
    h1 = jnp.maximum(h1, 0.0)                                   # ReLU
    h2 = jnp.dot(h1, w2_ref[...], preferred_element_type=jnp.float32) + b2_ref[...]
    h2 = jnp.maximum(h2, 0.0)                                   # ReLU
    out = jnp.dot(h2, w3_ref[...], preferred_element_type=jnp.float32) + b3_ref[...]
    o_ref[...] = out[None].astype(o_ref.dtype)


def cs_noise_transformer_forward(noise, X, params, *, tm=512):
    """Pallas equivalent of the noise-transformer forward: F(noise, X) -> [n_sample, n, dout]."""
    n_sample, n, dnoise = noise.shape
    din = X.shape[-1]
    dh1 = params["w1x"].shape[1]
    dh2 = params["w2"].shape[1]
    dout = params["w3"].shape[1]

    # Row tiling: big tiles, padded to a multiple of the tile (no divisibility assert).
    tm_eff = min(tm, _round_up(n, 8))
    n_pad = _round_up(n, tm_eff)

    # Lane-dense output: pad dout up to a multiple of 128 (unmasked full-lane stores).
    dpad = _round_up(dout, 128)

    Xp = jnp.pad(X, ((0, n_pad - n), (0, 0)))
    noisep = jnp.pad(noise, ((0, 0), (0, n_pad - n), (0, 0)))
    w3p = jnp.pad(params["w3"], ((0, 0), (0, dpad - dout)))
    b3p = jnp.pad(params["b3"], ((0, 0), (0, dpad - dout)))

    grid = (n_sample, n_pad // tm_eff)
    const = lambda s, i: (0, 0)   # weights/biases: same (whole) block every grid step

    out = pl.pallas_call(
        _mlp_kernel,
        out_shape=jax.ShapeDtypeStruct((n_sample, n_pad, dpad), noise.dtype),
        grid_spec=pltpu.PrefetchScalarGridSpec(
            num_scalar_prefetch=0,
            grid=grid,
            in_specs=[
                pl.BlockSpec((tm_eff, din), lambda s, i: (i, 0)),           # X rows (shared across samples)
                pl.BlockSpec((1, tm_eff, dnoise), lambda s, i: (s, i, 0)),  # noise tile
                pl.BlockSpec((din, dh1), const),                            # W1_x
                pl.BlockSpec((dnoise, dh1), const),                         # W1_n
                pl.BlockSpec((1, dh1), const),                              # b1
                pl.BlockSpec((dh1, dh2), const),                            # W2
                pl.BlockSpec((1, dh2), const),                              # b2
                pl.BlockSpec((dh2, dpad), const),                           # W3 (lane-padded)
                pl.BlockSpec((1, dpad), const),                             # b3 (lane-padded)
            ],
            out_specs=pl.BlockSpec((1, tm_eff, dpad), lambda s, i: (s, i, 0)),
        ),
        compiler_params=pltpu.CompilerParams(
            dimension_semantics=("parallel", "parallel"),
        ),
    )(Xp, noisep, params["w1x"], params["w1n"], params["b1"],
      params["w2"], params["b2"], w3p, b3p)

    # Strip row padding and the lane padding of the output features.
    return out[:, :n, :dout]


def init_params(key, din, dnoise, dh1, dh2, dout, dtype=jnp.float32):
    """Deterministic synthetic init (PyTorch nn.Linear-style uniform ranges).
    Weights stored as [in, out]; W1 is split into the X part and the noise part."""
    dfull = din + dnoise
    ks = jax.random.split(key, 6)

    def lin(kw, kb, fan_in, fan_out):
        bound = 1.0 / jnp.sqrt(fan_in)
        w = jax.random.uniform(kw, (fan_in, fan_out), dtype, -bound, bound)
        b = jax.random.uniform(kb, (1, fan_out), dtype, -bound, bound)
        return w, b

    w1, b1 = lin(ks[0], ks[1], dfull, dh1)
    w2, b2 = lin(ks[2], ks[3], dh1, dh2)
    w3, b3 = lin(ks[4], ks[5], dh2, dout)
    return dict(
        w1x=w1[:din], w1n=w1[din:], b1=b1,   # split of the concat-layer weight
        w2=w2, b2=b2, w3=w3, b3=b3,
        _w1_full=w1,                          # kept only for the reference check
    )


if __name__ == "__main__":
    # Module hyperparams. n deliberately NOT a multiple of 8 to exercise row padding.
    din, dnoise, dh1, dh2, dout = 6, 2, 32, 32, 16
    n_sample, n = 3, 10

    key = jax.random.PRNGKey(0)
    k_x, k_noise, k_p = jax.random.split(key, 3)

    X = jax.random.normal(k_x, (n, din), jnp.float32)
    noise = jax.random.normal(k_noise, (n_sample, n, dnoise), jnp.float32)
    params = init_params(k_p, din, dnoise, dh1, dh2, dout)

    out = cs_noise_transformer_forward(noise, X, params, tm=512)
    out = jax.block_until_ready(out)

    # pure-JAX reference of the original concat formulation
    X_ = jnp.broadcast_to(X[None], (n_sample, n, din))
    Xin = jnp.concatenate([X_, noise], axis=-1)
    h1 = jnp.maximum(Xin @ params["_w1_full"] + params["b1"][0], 0.0)
    h2 = jnp.maximum(h1 @ params["w2"] + params["b2"][0], 0.0)
    ref = h2 @ params["w3"] + params["b3"][0]

    assert out.shape == (n_sample, n, dout)
    assert jnp.allclose(out, ref, atol=1e-5, rtol=1e-5)
    print("KERNEL_OK")
</pallas_src>

<mosaic_0001>
module attributes {stable_mosaic.version = 11 : i64} {
  func.func @_mlp_kernel(%arg0: i32, %arg1: i32, %arg2: memref<16x6xf32, #tpu.memory_space<vmem>>, %arg3: memref<1x16x2xf32, #tpu.memory_space<vmem>>, %arg4: memref<6x32xf32, #tpu.memory_space<vmem>>, %arg5: memref<2x32xf32, #tpu.memory_space<vmem>>, %arg6: memref<1x32xf32, #tpu.memory_space<vmem>>, %arg7: memref<32x32xf32, #tpu.memory_space<vmem>>, %arg8: memref<1x32xf32, #tpu.memory_space<vmem>>, %arg9: memref<32x128xf32, #tpu.memory_space<vmem>>, %arg10: memref<1x128xf32, #tpu.memory_space<vmem>>, %arg11: memref<1x16x128xf32, #tpu.memory_space<vmem>>) attributes {dimension_semantics = [#tpu.dimension_semantics<parallel>, #tpu.dimension_semantics<parallel>], iteration_bounds = array<i64: 3, 1>, scalar_prefetch = 0 : i64, scratch_operands = 0 : i64, tpu.core_type = #tpu.core_type<tc>, window_params = [{transform_indices = @transform_0, window_bounds = array<i64: 16, 6>}, {transform_indices = @transform_1, window_bounds = array<i64: 1, 16, 2>}, {pipeline_mode = #tpu.pipeline_mode<synchronous>, transform_indices = @transform_2, window_bounds = array<i64: 6, 32>}, {pipeline_mode = #tpu.pipeline_mode<synchronous>, transform_indices = @transform_3, window_bounds = array<i64: 2, 32>}, {pipeline_mode = #tpu.pipeline_mode<synchronous>, transform_indices = @transform_4, window_bounds = array<i64: 1, 32>}, {pipeline_mode = #tpu.pipeline_mode<synchronous>, transform_indices = @transform_5, window_bounds = array<i64: 32, 32>}, {pipeline_mode = #tpu.pipeline_mode<synchronous>, transform_indices = @transform_6, window_bounds = array<i64: 1, 32>}, {pipeline_mode = #tpu.pipeline_mode<synchronous>, transform_indices = @transform_7, window_bounds = array<i64: 32, 128>}, {pipeline_mode = #tpu.pipeline_mode<synchronous>, transform_indices = @transform_8, window_bounds = array<i64: 1, 128>}, {transform_indices = @transform_9, window_bounds = array<i64: 1, 16, 128>}]} {
    %c0 = arith.constant 0 : index
    %c0_0 = arith.constant 0 : index
    %0 = vector.load %arg2[%c0, %c0_0] : memref<16x6xf32, #tpu.memory_space<vmem>>, vector<16x6xf32>
    %c0_1 = arith.constant 0 : index
    %c0_2 = arith.constant 0 : index
    %c0_3 = arith.constant 0 : index
    %1 = vector.load %arg3[%c0_1, %c0_2, %c0_3] : memref<1x16x2xf32, #tpu.memory_space<vmem>>, vector<1x16x2xf32>
    %2 = vector.shape_cast %1 : vector<1x16x2xf32> to vector<16x2xf32>
    %c0_4 = arith.constant 0 : index
    %c0_5 = arith.constant 0 : index
    %3 = vector.load %arg4[%c0_4, %c0_5] : memref<6x32xf32, #tpu.memory_space<vmem>>, vector<6x32xf32>
    %cst = arith.constant dense<0.000000e+00> : vector<16x32xf32>
    %4 = tpu.matmul %0, %3, %cst {dimension_numbers = #tpu.dot_dimension_numbers<[1], [0], [0], [1], [0, 0, 1, 1], [], []>} : vector<16x6xf32>, vector<6x32xf32>, vector<16x32xf32> -> vector<16x32xf32>
    %c0_6 = arith.constant 0 : index
    %c0_7 = arith.constant 0 : index
    %5 = vector.load %arg5[%c0_6, %c0_7] : memref<2x32xf32, #tpu.memory_space<vmem>>, vector<2x32xf32>
    %cst_8 = arith.constant dense<0.000000e+00> : vector<16x32xf32>
    %6 = tpu.matmul %2, %5, %cst_8 {dimension_numbers = #tpu.dot_dimension_numbers<[1], [0], [0], [1], [0, 0, 1, 1], [], []>} : vector<16x2xf32>, vector<2x32xf32>, vector<16x32xf32> -> vector<16x32xf32>
    %7 = arith.addf %4, %6 : vector<16x32xf32>
    %c0_9 = arith.constant 0 : index
    %c0_10 = arith.constant 0 : index
    %8 = vector.load %arg6[%c0_9, %c0_10] : memref<1x32xf32, #tpu.memory_space<vmem>>, vector<1x32xf32>
    %9 = vector.broadcast %8 : vector<1x32xf32> to vector<16x32xf32>
    %10 = arith.addf %7, %9 : vector<16x32xf32>
    %cst_11 = arith.constant 0.000000e+00 : f32
    %11 = vector.broadcast %cst_11 : f32 to vector<16x32xf32>
    %12 = arith.maximumf %10, %11 : vector<16x32xf32>
    %c0_12 = arith.constant 0 : index
    %c0_13 = arith.constant 0 : index
    %13 = vector.load %arg7[%c0_12, %c0_13] : memref<32x32xf32, #tpu.memory_space<vmem>>, vector<32x32xf32>
    %cst_14 = arith.constant dense<0.000000e+00> : vector<16x32xf32>
    %14 = tpu.matmul %12, %13, %cst_14 {dimension_numbers = #tpu.dot_dimension_numbers<[1], [0], [0], [1], [0, 0, 1, 1], [], []>} : vector<16x32xf32>, vector<32x32xf32>, vector<16x32xf32> -> vector<16x32xf32>
    %c0_15 = arith.constant 0 : index
    %c0_16 = arith.constant 0 : index
    %15 = vector.load %arg8[%c0_15, %c0_16] : memref<1x32xf32, #tpu.memory_space<vmem>>, vector<1x32xf32>
    %16 = vector.broadcast %15 : vector<1x32xf32> to vector<16x32xf32>
    %17 = arith.addf %14, %16 : vector<16x32xf32>
    %cst_17 = arith.constant 0.000000e+00 : f32
    %18 = vector.broadcast %cst_17 : f32 to vector<16x32xf32>
    %19 = arith.maximumf %17, %18 : vector<16x32xf32>
    %c0_18 = arith.constant 0 : index
    %c0_19 = arith.constant 0 : index
    %20 = vector.load %arg9[%c0_18, %c0_19] : memref<32x128xf32, #tpu.memory_space<vmem>>, vector<32x128xf32>
    %cst_20 = arith.constant dense<0.000000e+00> : vector<16x128xf32>
    %21 = tpu.matmul %19, %20, %cst_20 {dimension_numbers = #tpu.dot_dimension_numbers<[1], [0], [0], [1], [0, 0, 1, 1], [], []>} : vector<16x32xf32>, vector<32x128xf32>, vector<16x128xf32> -> vector<16x128xf32>
    %c0_21 = arith.constant 0 : index
    %c0_22 = arith.constant 0 : index
    %22 = vector.load %arg10[%c0_21, %c0_22] : memref<1x128xf32, #tpu.memory_space<vmem>>, vector<1x128xf32>
    %23 = vector.broadcast %22 : vector<1x128xf32> to vector<16x128xf32>
    %24 = arith.addf %21, %23 : vector<16x128xf32>
    %25 = vector.shape_cast %24 : vector<16x128xf32> to vector<1x16x128xf32>
    %c0_23 = arith.constant 0 : index
    %c0_24 = arith.constant 0 : index
    %c0_25 = arith.constant 0 : index
    %26 = vector.load %arg11[%c0_23, %c0_24, %c0_25] : memref<1x16x128xf32, #tpu.memory_space<vmem>>, vector<1x16x128xf32>
    tpu.vector_store %arg11[%c0_23, %c0_24, %c0_25], %25 {strides = array<i32>} : memref<1x16x128xf32, #tpu.memory_space<vmem>>, vector<1x16x128xf32>,
    return
  }
  func.func @transform_0(%arg0: i32, %arg1: i32) -> (i32, i32) {
    %c0_i32 = arith.constant 0 : i32
    %c0_i32_0 = arith.constant 0 : i32
    return %arg1, %c0_i32 : i32, i32
  }
  func.func @transform_1(%arg0: i32, %arg1: i32) -> (i32, i32, i32) {
    %c0_i32 = arith.constant 0 : i32
    %c0_i32_0 = arith.constant 0 : i32
    return %arg0, %arg1, %c0_i32 : i32, i32, i32
  }
  func.func @transform_2(%arg0: i32, %arg1: i32) -> (i32, i32) {
    %c0_i32 = arith.constant 0 : i32
    %c0_i32_0 = arith.constant 0 : i32
    %c0_i32_1 = arith.constant 0 : i32
    return %c0_i32, %c0_i32_0 : i32, i32
  }
  func.func @transform_3(%arg0: i32, %arg1: i32) -> (i32, i32) {
    %c0_i32 = arith.constant 0 : i32
    %c0_i32_0 = arith.constant 0 : i32
    %c0_i32_1 = arith.constant 0 : i32
    return %c0_i32, %c0_i32_0 : i32, i32
  }
  func.func @transform_4(%arg0: i32, %arg1: i32) -> (i32, i32) {
    %c0_i32 = arith.constant 0 : i32
    %c0_i32_0 = arith.constant 0 : i32
    %c0_i32_1 = arith.constant 0 : i32
    return %c0_i32, %c0_i32_0 : i32, i32
  }
  func.func @transform_5(%arg0: i32, %arg1: i32) -> (i32, i32) {
    %c0_i32 = arith.constant 0 : i32
    %c0_i32_0 = arith.constant 0 : i32
    %c0_i32_1 = arith.constant 0 : i32
    return %c0_i32, %c0_i32_0 : i32, i32
  }
  func.func @transform_6(%arg0: i32, %arg1: i32) -> (i32, i32) {
    %c0_i32 = arith.constant 0 : i32
    %c0_i32_0 = arith.constant 0 : i32
    %c0_i32_1 = arith.constant 0 : i32
    return %c0_i32, %c0_i32_0 : i32, i32
  }
  func.func @transform_7(%arg0: i32, %arg1: i32) -> (i32, i32) {
    %c0_i32 = arith.constant 0 : i32
    %c0_i32_0 = arith.constant 0 : i32
    %c0_i32_1 = arith.constant 0 : i32
    return %c0_i32, %c0_i32_0 : i32, i32
  }
  func.func @transform_8(%arg0: i32, %arg1: i32) -> (i32, i32) {
    %c0_i32 = arith.constant 0 : i32
    %c0_i32_0 = arith.constant 0 : i32
    %c0_i32_1 = arith.constant 0 : i32
    return %c0_i32, %c0_i32_0 : i32, i32
  }
  func.func @transform_9(%arg0: i32, %arg1: i32) -> (i32, i32, i32) {
    %c0_i32 = arith.constant 0 : i32
    %c0_i32_0 = arith.constant 0 : i32
    return %arg0, %arg1, %c0_i32 : i32, i32, i32
  }
}

</mosaic_0001>

<bundles_post_ra>
// kernel: tpu_custom_call.1
= control target key start
LH: loop header
LB: loop body
LE: loop exit
PB: predicated region body
PF: predicated region fallthrough
CT: control target
= control target key end

     0   :  { %14 = vsyncpa [#allocation3], 0  ;;  %s1302_s0 = inlined_call_operand.vmem [shape: f32[16,6], index: 0, kind: input, shape index: {}]   ;;  %s1303_s1 = inlined_call_operand.vmem [shape: f32[3,16,2], index: 1, kind: input, shape index: {}]   ;;  %s1304_s2 = inlined_call_operand.vmem [shape: f32[6,32], index: 2, kind: input, shape index: {}]   ;;  %s1305_s3 = inlined_call_operand.vmem [shape: f32[2,32], index: 3, kind: input, shape index: {}]   ;;  %s1306_s4 = inlined_call_operand.vmem [shape: f32[1,32], index: 4, kind: input, shape index: {}]   ;;  %s1307_s5 = inlined_call_operand.vmem [shape: f32[32,32], index: 5, kind: input, shape index: {}]   ;;  %s1308_s6 = inlined_call_operand.vmem [shape: f32[1,32], index: 6, kind: input, shape index: {}]   ;;  %s1309_s7 = inlined_call_operand.vmem [shape: f32[32,128], index: 7, kind: input, shape index: {}]   ;;  %s1310_s8 = inlined_call_operand.vmem [shape: f32[1,128], index: 8, kind: input, shape index: {}]   ;;  %s1311_s9 = inlined_call_operand.hbm [shape: f32[3,16,128], index: 9, kind: output, shape index: {}]  }
   0x1   :  { %16 = vsyncpa [#allocation3 + $0x1], 0  ;;  %s1139_s30 = smov 0   ;;  %s1141_s10 = smov 0  }
   0x2   :  { %s1143_s11 = smov 0   ;;  %s1145_s12 = smov 0  }
   0x3   :  { %s1147_s13 = smov 0   ;;  %s1149_s14 = smov 0  }
   0x4 LB: > { %s872_s15 = sadd.s32 4294967295, %s1084_s14   ;;  %s873_s16 = sadd.s32 4294967294, %s1084_s14   ;;  %s1084_s14 = sphi %s1149_s14, %s22_s14   ;;  %s1080_s13 = sphi %s1147_s13, %s1318_s13   ;;  %s1076_s12 = sphi %s1145_s12, %s1317_s12   ;;  %s1072_s11 = sphi %s1143_s11, %s1316_s11   ;;  %s1068_s10 = sphi %s1141_s10, %s1315_s10   ;;  %s1064_s30 = sphi %s1139_s30, %s1314_s30  }
   0x5   : > { %s34_s17 = sadd.s32 1, %s1080_s13  ;;  %s244_s18 = sadd.s32 1, %s1072_s11 }
   0x6   : > { %p36_p0 = scmp.ge.s32.totalorder %s34_s17, 3  ;;  %p254_p1 = scmp.ne.s32.totalorder %s1072_s11, %s1068_s10 }
   0x7   : > { %p255_p2 = scmp.eq.s32.totalorder %s872_s15, 2  ;;  %p260_p3 = scmp.ne.s32.totalorder %s1068_s10, %s1064_s30 }
   0x8   : > { %s1320_s17 = smov (%p36_p0, %s34_s17), 0  ;;  %p261_p5 = scmp.eq.s32.totalorder %s873_s16, 2 }
   0x9   : > { %p1179_p4 = por %p255_p2, %p254_p1  ;;  %s239_s20 = ssub.s32 %s1080_s13, %s1320_s17 }
   0xa   : > { %p877_p6 = scmp.ge.s32.totalorder %s1084_s14, 1  ;;  %p242_p7 = scmp.eq.s32.totalorder %s239_s20, 0 }
   0xb   : > { %p1186_p8 = por %p261_p5, %p260_p3  ;;  %p322_p9 = scmp.lt.s32.totalorder %s1084_s14, 4 }
   0xc   : > { %s1192_s22 = scalar_select %p242_p7, %s1072_s11, %s244_s18  }
   0xd   : > { %p323_p10 = pnand %p877_p6, %p322_p9 }
   0xe   : > { %p374_p11 = scmp.lt.s32.totalorder (!%p323_p10), %s1076_s12, 2  ;;  %s364_s23 = sand.u32 (!%p323_p10), 1, %s1068_s10  }
   0xf   : > { %326 = sbr.rel (%p323_p10) target bundleno = 640 (0x280), region = 56  ;;  %s900_s29 = sshll.u32 (!%p323_p10), %s1076_s12, 8 }
  0x10   : > { %s1257_s20 = scalar_lea.sflag (!%p323_p10), [#allocation3], %s364_s23 }
  0x14   : > { %v388_v0 = vld [vmem:[%s1304_s2] sm:$0x3f]  ;;  %vm483_vm0 = vcmask 1045504   ;;  %vm476_vm1 = vcmask 48128   ;;  %vm397_vm2 = vcmask 1041408   ;;  %v385_v3 = vld [vmem:[%s1302_s0 + $0x8] sm:$0xff] }
  0x15   : > { %v384_v1 = vld [vmem:[%s1302_s0] sm:$0xff]  ;;  %924 = vmatprep.subr.msk.mxu1 %vm483_vm0, %v388_v0  ;;  %s375_s16 = scalar_select %p374_p11, %s1076_s12, 2  ;;  %vm390_vm3 = vcmask 15360   ;;  %v576_v6 = vld [vmem:[%s1307_s5 + $0x18] sm:$0xff]  ;;  %v575_v7 = vld [vmem:[%s1307_s5 + $0x10] sm:$0xff]  ;;  %vm584_vm4 = vcmask 261120  }
  0x16   : > { %926 = vmatprep.mubr.msk.f32.mxu1 %vm476_vm1, %v384_v1  ;;  %v389_v2 = vld [vmem:[%s1305_s3] sm:$0x3]  ;;  %925 = vmatpush3.msk.msra.mxu1 %vm483_vm0, %v388_v0  ;;  %v574_v8 = vld [vmem:[%s1307_s5 + $0x8] sm:$0xff]  ;;  %v671_v21 = vld [vmem:[%s1309_s7 + $0x18] sm:$0xff]  ;;  %s1086_s12 = smov [#allocation2]  }
  0x17   : > { %919 = vmatprep.subr.msk.mxu0 %vm397_vm2, %v389_v2  ;;  %927 = vmatmul.mubr.msk.f32.vlgmr.msra.gmra.mxu1 %vm476_vm1, %v385_v3  ;;  %s899_s18 = sshll.u32 %s375_s16, 4  ;;  %v573_v9 = vld [vmem:[%s1307_s5] sm:$0xff]  ;;  %v670_v22 = vld [vmem:[%s1309_s7 + $0x10] sm:$0xff]  ;;  %v669_v23 = vld [vmem:[%s1309_s7 + $0x8] sm:$0xff]  ;;  %s1012_s25 = sshll.u32 %s1086_s12, 4  ;;  %s1013_s25 = int_to_ptr.vmem [resolvable:$false] %s1012_s25 }
  0x18   : > { %920 = vmatpush3.msk.msra.mxu0 %vm397_vm2, %v389_v2  ;;  %s381_s24 = scalar_lea.vmem %s1303_s1, %s899_s18  ;;  %v887_v13 = vld [vmem:[%s1306_s4] ss:$0 sm:$0xff]  ;;  %940 = vmatprep.subr.mxu1 %v671_v21  ;;  %s1255_s18 = scalar_lea.hbm %s1311_s9, %s900_s29 }
  0x19   : > { %v386_v4 = vld [vmem:[%s381_s24] sm:$0xff]  ;;  %v387_v5 = vld [vmem:[%s381_s24 + $0x8] sm:$0xff]  ;;  %929 = vmatprep.subr.mxu0 %v576_v6  ;;  %941 = vmatpush3.msra.mxu1 %v671_v21  ;;  %s878_s24 = sshll.u32 %s364_s23, 4  ;;  %s1014_s26 = scalar_lea.vmem %s1013_s25, 512 }
  0x1a   : > { %921 = vmatprep.mubr.msk.f32.mxu0 %vm390_vm3, %v386_v4  ;;  %942 = vmatprep.subr.mxu1 %v670_v22  ;;  %v668_v24 = vld [vmem:[%s1309_s7] sm:$0xff]  ;;  %s366_s27 = scalar_lea.vmem [#allocation2], %s878_s24 }
  0x1b   : > { %922 = vmatmul.mubr.msk.f32.vlgmr.msra.gmra.mxu0 %vm390_vm3, %v387_v5  ;;  %943 = vmatpush3.msra.mxu1 %v670_v22  ;;  %v888_v25 = vld [vmem:[%s1308_s6] ss:$0 sm:$0xff]  ;;  %s778_s28 = sshll.u32 %s366_s27, 4  ;;  %s1250_s28 = int_to_ptr.vmem [resolvable:$true] %s778_s28 }
  0x1c   : > { %930 = vmatpush3.msra.mxu0 %v576_v6  ;;  %944 = vmatprep.subr.mxu1 %v669_v23  ;;  %v891_v32 = vld [vmem:[%s1310_s8] ss:$0 sm:$0xff]  ;;  %s1008_s24 = scalar_lea.vmem %s1250_s28, 256  ;;  %p1015_p1 = scmp.lt.s32.totalorder %s1250_s28, %s1013_s25 }
  0x1d   : > { %931 = vmatprep.subr.mxu0 %v575_v7  ;;  %945 = vmatpush3.msra.mxu1 %v669_v23  ;;  %p1009_p12 = scmp.ne.s32.totalorder %s1250_s28, %s1008_s24  ;;  %p1016_p2 = scmp.lt.s32.totalorder %s1014_s26, %s1008_s24 }
  0x1e   : > { %932 = vmatpush3.msra.mxu0 %v575_v7  ;;  %946 = vmatprep.subr.mxu1 %v668_v24 }
  0x1f   : > { %933 = vmatprep.subr.mxu0 %v574_v8  ;;  %947 = vmatpush3.msra.mxu1 %v668_v24  ;;  %p1010_p13 = pnand %p1009_p12, %p1179_p4  ;;  %p1017_p3 = por %p1016_p2, %p1015_p1 }
  0x20   : > { %934 = vmatpush3.msra.mxu0 %v574_v8 }
  0x21   : > { %935 = vmatprep.subr.mxu0 %v573_v9  ;;  %p1011_p0 = pneg %p1010_p13 }
  0x22   : > { %936 = vmatpush3.msra.mxu0 %v573_v9 }
  0x23   : > { %p1018_p5 = pnand %p1017_p3, %p1011_p0 }
  0xd7   : > { %v928_v10 = vpop.f32.mrf.mxu1 }
  0xd9   : > { %v553_v14 = vpop.f32.mrf.mxu1 }
  0xdb   : > { %v923_v11 = vpop.f32.mrf.mxu0 }
  0xdc   : > { %v559_v12 = vadd.f32 %v928_v10, %v923_v11 }
  0xdd   : > { %v467_v15 = vpop.f32.mrf.mxu0 }
  0xde   : > { %v554_v16 = vadd.f32 %v553_v14, %v467_v15  ;;  %v570_v17 = vadd.f32 %v887_v13, %v559_v12 }
  0xe0   : > { %v569_v18 = vadd.f32 %v887_v13, %v554_v16  ;;  %v572_v20 = vmax.f32 %v570_v17, 0.0 }
  0xe2   : > { %v571_v19 = vmax.f32 %v569_v18, 0.0 }
  0xe4   : > { %937 = vmatprep.mubr.msk.f32.mxu0 %vm584_vm4, %v571_v19 }
  0xe5   : > { %938 = vmatmul.mubr.msk.f32.vlgmr.msra.gmra.mxu0 %vm584_vm4, %v572_v20 }
 0x1a5   : > { %v939_v26 = vpop.f32.mrf.mxu0 }
 0x1a6   : > { %v663_v27 = vadd.f32 %v939_v26, %v888_v25 }
 0x1a7   : > { %v657_v28 = vpop.f32.mrf.mxu0 }
 0x1a8   : > { %v658_v29 = vadd.f32 %v888_v25, %v657_v28  ;;  %v667_v31 = vmax.f32 %v663_v27, 0.0 }
 0x1aa   : > { %v666_v30 = vmax.f32 %v658_v29, 0.0 }
 0x1ac   : > { %948 = vmatprep.mubr.msk.f32.mxu1 %vm584_vm4, %v666_v30 }
 0x1ad   : > { %949 = vmatmul.mubr.msk.f32.vlgmr.msra.gmra.mxu1 %vm584_vm4, %v667_v31 }
 0x26d   : > { %v950_v33 = vpop.f32.mrf.mxu1 }
 0x26e   : > { %v757_v34 = vadd.f32 %v950_v33, %v891_v32 }
 0x26f   : > { %v751_v35 = vpop.f32.mrf.mxu1 }
 0x270   : > { %761 = vst [vmem:[%s366_s27 + $0x8] sm:$0xff] %v757_v34  ;;  %v752_v36 = vadd.f32 %v891_v32, %v751_v35 }
 0x272   : > { %760 = vst [vmem:[%s366_s27] sm:$0xff] %v752_v36 }
 0x273   : > { %1021 = shalt.err (!%p1018_p5)
}
 0x274   : > { %s1022_s23 = scalar_lea.hbm %s1255_s18, 256  ;;  %s1026_s15 = scalar_lea.hbm %s1311_s9, 768 }
 0x275   : > { %p1023_p6 = scmp.ne.s32.totalorder %s1255_s18, %s1022_s23  ;;  %p1027_p10 = scmp.lt.s32.totalorder %s1255_s18, %s1311_s9 }
 0x276   : > { %p1028_p11 = scmp.lt.s32.totalorder %s1026_s15, %s1022_s23 }
 0x277   : > { %p1024_p7 = pnand %p1023_p6, %p1179_p4 }
 0x278   : > { %p1029_p12 = por %p1028_p11, %p1027_p10 }
 0x279   : > { %p1025_p9 = pneg %p1024_p7 }
 0x27b   : > { %p1030_p13 = pnand %p1029_p12, %p1025_p9 }
 0x27d   : > { %1033 = shalt.err (!%p1030_p13)
}
 0x27e   : > { %s1087_s24 = smov 128   ;;  %s1088_s25 = smov 8  }
 0x27f   : > { %951 = dma.vmem_to_hbm [thread:$0]  (%p1179_p4), %s1250_s28, 256, %s1255_s18, %s1257_s20, %s1087_s24, %s1087_s24, %s1088_s25  }
 0x280 PF: > { %p957_p0 = scmp.ge.s32.totalorder %s1084_s14, 2  ;;  %s793_s26 = sand.u32 1, %s1064_s30  }
 0x281   : > { %s794_s23 = scalar_lea.sflag [#allocation3], %s793_s26 }
 0x282   : > { %p954_p1 = pnand %p957_p0, %p1186_p8 }
 0x284   : > { %p955_p2 = pneg %p954_p1 }
 0x286   : > { %1059 = dma.done.wait (%p955_p2), %s794_s23, 256  }
 0x287   : > { %1061 = vsyncadd (%p955_p2), %s794_s23, 4294967040  ;;  %s22_s14 = sadd.s32 1, %s1084_s14   ;;  %s1314_s30 = smov %s1068_s10 }
 0x288   : > { %p19_p3 = scmp.ge.s32.totalorder %s22_s14, 5   ;;  %s1315_s10 = smov %s1072_s11 }
 0x289   : > { %s1316_s11 = smov %s1192_s22  ;;  %s1317_s12 = smov %s1080_s13 }
 0x28a   : > { %s1318_s13 = smov %s1320_s17  ;;  %21 = sbr.rel (!%p19_p3) target bundleno = 4 (0x4), region = 94 }
 0x28f   :  { %799 = vsyncpa [#allocation3], 1 }
 0x290   :  { %801 = vsyncpa [#allocation3 + $0x1], 1 }

</bundles_post_ra>
